<compile_context>
chip_gen: v5e
topology: v5e:2x2
jax: 0.10.0
libtpu: 0.0.40
codegen_flags: <defaults>
</compile_context>

<pallas_src>
import functools

import jax
import jax.numpy as jnp
from jax.experimental import pallas as pl
from jax.experimental.pallas import tpu as pltpu

_LANE = 128
_SUBLANE = 8
# Below this, kernel-launch overhead dominates; plain fused XLA is faster.
_FAST_PATH_MAX_ELEMS = 1 << 16


def _round_up(x: int, m: int) -> int:
    return ((x + m - 1) // m) * m


def _inplace_update_kernel(a_ref, b_ref, a_out_ref, bm1_ref, bp1_ref):
    """Elementwise: a_out = a - b ; bm1 = b - 1 ; bp1 = b + 1."""
    b = b_ref[...]
    one = jnp.asarray(1, dtype=b.dtype)       # dtype-safe (floats and ints)
    a_out_ref[...] = a_ref[...] - b            # models torch's a.sub_(b)
    bm1_ref[...] = b - one
    bp1_ref[...] = b + one


def _pallas_update_2d(a2, b2, *, block_rows, core_parallel):
    rows, cols = a2.shape
    blk = min(_round_up(block_rows, _SUBLANE), _round_up(rows, _SUBLANE))
    grid = (pl.cdiv(rows, blk),)               # last block may be partial (masked)
    spec = pl.BlockSpec((blk, cols), lambda i: (i, 0))
    itemsize = jnp.dtype(a2.dtype).itemsize
    cost = pl.CostEstimate(
        flops=3 * rows * cols,
        transcendentals=0,
        bytes_accessed=5 * rows * cols * itemsize,   # 2 reads + 3 writes
    )
    semantics = (pltpu.CORE_PARALLEL,) if core_parallel else ("parallel",)
    out_shape = tuple(jax.ShapeDtypeStruct((rows, cols), a2.dtype) for _ in range(3))
    return pl.pallas_call(
        _inplace_update_kernel,
        out_shape=out_shape,
        grid=grid,
        in_specs=[spec, spec],
        out_specs=(spec, spec, spec),
        input_output_aliases={0: 0},           # a_new aliases (the view of) a
        compiler_params=pltpu.CompilerParams(dimension_semantics=semantics),
        cost_estimate=cost,
    )(a2, b2)


def module_inplace_update(a, b, *, block_rows=2048, force_pallas=False,
                          core_parallel=False):
    """Functional ModuleInplaceUpdate.forward: returns (a - b, b - 1, b + 1).

    The first output models torch's in-place `a.sub_(b)`; it is buffer-aliased
    to `a` inside the pallas_call (truly in place when the caller donates `a`).
    """
    n = a.shape[0]

    # Fast path: tiny or non-lane-aligned inputs. This elementwise op is
    # HBM-bound, so fused XLA is already at roofline and avoids both launch
    # overhead and any pad copy.
    if not force_pallas and (n < _FAST_PATH_MAX_ELEMS or n % _LANE != 0):
        one = jnp.asarray(1, dtype=b.dtype)
        return a - b, b - one, b + one

    if n % _LANE == 0:
        # Zero-copy path: 1-D -> (rows, 128) reshape is a bitcast; no padding,
        # no output slicing, alias hits the caller's real buffer.
        rows = n // _LANE
        a2 = a.reshape(rows, _LANE)
        b2 = b.reshape(rows, _LANE)
        a_new, bm1, bp1 = _pallas_update_2d(
            a2, b2, block_rows=block_rows, core_parallel=core_parallel)
        return a_new.reshape(n), bm1.reshape(n), bp1.reshape(n)

    # Ragged N forced through Pallas: pad the tail up to a full (8,128) tile.
    # TODO(synk): for large unaligned N, avoid this pad copy by keeping the
    # arrays 1-D and masking the final block's stores via scalar-prefetched n.
    padded = _round_up(n, _LANE * _SUBLANE)
    rows = padded // _LANE
    a2 = jnp.zeros((padded,), a.dtype).at[:n].set(a).reshape(rows, _LANE)
    b2 = jnp.zeros((padded,), b.dtype).at[:n].set(b).reshape(rows, _LANE)
    a_new, bm1, bp1 = _pallas_update_2d(
        a2, b2, block_rows=block_rows, core_parallel=core_parallel)
    return (a_new.reshape(-1)[:n], bm1.reshape(-1)[:n], bp1.reshape(-1)[:n])


if __name__ == "__main__":
    key = jax.random.PRNGKey(0)
    k0, k1, k2, k3 = jax.random.split(key, 4)

    # Case 1: the module's own shape (two length-10 vectors), forced through
    # the Pallas path (pads 10 -> one (8,128) tile; trivial at this size).
    a_small = jax.random.normal(k0, (10,), dtype=jnp.float32)
    b_small = jax.random.normal(k1, (10,), dtype=jnp.float32)
    ref_small = (a_small - b_small, b_small - 1.0, b_small + 1.0)

    small_fn = jax.jit(functools.partial(module_inplace_update, force_pallas=True))
    out_small = jax.block_until_ready(small_fn(a_small, b_small))

    # Case 2: lane-aligned size exercising the zero-copy path, multiple grid
    # steps and a partial (masked) final row-block; `a` is donated so the
    # aliased first output is a genuine in-place update. References are
    # computed BEFORE the call; the donated `a_big` is never read afterwards.
    n_big = 40 * _LANE                         # 5120 elems = 40 rows x 128 lanes
    a_big = jax.random.normal(k2, (n_big,), dtype=jnp.float32)
    b_big = jax.random.normal(k3, (n_big,), dtype=jnp.float32)
    ref_big = (a_big - b_big, b_big - 1.0, b_big + 1.0)

    big_fn = jax.jit(
        functools.partial(module_inplace_update, force_pallas=True, block_rows=16),
        donate_argnums=(0,))
    out_big = jax.block_until_ready(big_fn(a_big, b_big))

    for got, want in zip(out_small, ref_small):
        assert got.shape == want.shape
        assert jnp.allclose(got, want, atol=1e-6)
    for got, want in zip(out_big, ref_big):
        assert got.shape == want.shape
        assert jnp.allclose(got, want, atol=1e-6)

    print("KERNEL_OK")
</pallas_src>

<mosaic_0001>
module attributes {stable_mosaic.version = 11 : i64} {
  func.func @_inplace_update_kernel(%arg0: i32, %arg1: memref<8x128xf32, #tpu.memory_space<vmem>>, %arg2: memref<8x128xf32, #tpu.memory_space<vmem>>, %arg3: memref<8x128xf32, #tpu.memory_space<vmem>>, %arg4: memref<8x128xf32, #tpu.memory_space<vmem>>, %arg5: memref<8x128xf32, #tpu.memory_space<vmem>>) attributes {dimension_semantics = [#tpu.dimension_semantics<parallel>], iteration_bounds = array<i64: 1>, scalar_prefetch = 0 : i64, scratch_operands = 0 : i64, tpu.core_type = #tpu.core_type<tc>, window_params = [{transform_indices = @transform_0, window_bounds = array<i64: 8, 128>}, {transform_indices = @transform_1, window_bounds = array<i64: 8, 128>}, {transform_indices = @transform_2, window_bounds = array<i64: 8, 128>}, {transform_indices = @transform_3, window_bounds = array<i64: 8, 128>}, {transform_indices = @transform_4, window_bounds = array<i64: 8, 128>}]} {
    %c0 = arith.constant 0 : index
    %c0_0 = arith.constant 0 : index
    %0 = vector.load %arg2[%c0, %c0_0] : memref<8x128xf32, #tpu.memory_space<vmem>>, vector<8x128xf32>
    %c0_1 = arith.constant 0 : index
    %c0_2 = arith.constant 0 : index
    %1 = vector.load %arg1[%c0_1, %c0_2] : memref<8x128xf32, #tpu.memory_space<vmem>>, vector<8x128xf32>
    %2 = arith.subf %1, %0 : vector<8x128xf32>
    %c0_3 = arith.constant 0 : index
    %c0_4 = arith.constant 0 : index
    %3 = vector.load %arg3[%c0_3, %c0_4] : memref<8x128xf32, #tpu.memory_space<vmem>>, vector<8x128xf32>
    tpu.vector_store %arg3[%c0_3, %c0_4], %2 {strides = array<i32>} : memref<8x128xf32, #tpu.memory_space<vmem>>, vector<8x128xf32>,
    %cst = arith.constant 1.000000e+00 : f32
    %4 = vector.broadcast %cst : f32 to vector<8x128xf32>
    %5 = arith.subf %0, %4 : vector<8x128xf32>
    %c0_5 = arith.constant 0 : index
    %c0_6 = arith.constant 0 : index
    %6 = vector.load %arg4[%c0_5, %c0_6] : memref<8x128xf32, #tpu.memory_space<vmem>>, vector<8x128xf32>
    tpu.vector_store %arg4[%c0_5, %c0_6], %5 {strides = array<i32>} : memref<8x128xf32, #tpu.memory_space<vmem>>, vector<8x128xf32>,
    %cst_7 = arith.constant 1.000000e+00 : f32
    %7 = vector.broadcast %cst_7 : f32 to vector<8x128xf32>
    %8 = arith.addf %0, %7 : vector<8x128xf32>
    %c0_8 = arith.constant 0 : index
    %c0_9 = arith.constant 0 : index
    %9 = vector.load %arg5[%c0_8, %c0_9] : memref<8x128xf32, #tpu.memory_space<vmem>>, vector<8x128xf32>
    tpu.vector_store %arg5[%c0_8, %c0_9], %8 {strides = array<i32>} : memref<8x128xf32, #tpu.memory_space<vmem>>, vector<8x128xf32>,
    return
  }
  func.func @transform_0(%arg0: i32) -> (i32, i32) {
    %c0_i32 = arith.constant 0 : i32
    %c0_i32_0 = arith.constant 0 : i32
    return %arg0, %c0_i32 : i32, i32
  }
  func.func @transform_1(%arg0: i32) -> (i32, i32) {
    %c0_i32 = arith.constant 0 : i32
    %c0_i32_0 = arith.constant 0 : i32
    return %arg0, %c0_i32 : i32, i32
  }
  func.func @transform_2(%arg0: i32) -> (i32, i32) {
    %c0_i32 = arith.constant 0 : i32
    %c0_i32_0 = arith.constant 0 : i32
    return %arg0, %c0_i32 : i32, i32
  }
  func.func @transform_3(%arg0: i32) -> (i32, i32) {
    %c0_i32 = arith.constant 0 : i32
    %c0_i32_0 = arith.constant 0 : i32
    return %arg0, %c0_i32 : i32, i32
  }
  func.func @transform_4(%arg0: i32) -> (i32, i32) {
    %c0_i32 = arith.constant 0 : i32
    %c0_i32_0 = arith.constant 0 : i32
    return %arg0, %c0_i32 : i32, i32
  }
}

</mosaic_0001>

<bundles_post_ra>
// kernel: module_inplace_update.1
= control target key start
LH: loop header
LB: loop body
LE: loop exit
PB: predicated region body
PF: predicated region fallthrough
CT: control target
= control target key end

     0   :  { %s75_s0 = inlined_call_operand.vmem [shape: f32[8,128], index: 0, kind: input, shape index: {}, may-alias: {0,2}]   ;;  %s76_s1 = inlined_call_operand.vmem [shape: f32[8,128], index: 1, kind: input, shape index: {}]   ;;  %s77_s2 = inlined_call_operand.vmem [shape: f32[8,128], index: 2, kind: output, shape index: {0}, may-alias: {0,2}]   ;;  %s78_s3 = inlined_call_operand.vmem [shape: f32[8,128], index: 3, kind: output, shape index: {1}]   ;;  %s79_s4 = inlined_call_operand.vmem [shape: f32[8,128], index: 4, kind: output, shape index: {2}]  }
   0x1   :  { %v14_v0 = vld [vmem:[%s76_s1] sm:$0xff] }
   0x2   :  { %v15_v1 = vld [vmem:[%s75_s0] sm:$0xff]  ;;  %v34_v3 = vadd.f32 -1.0, %v14_v0  ;;  %v20_v4 = vadd.f32 1.0, %v14_v0 }
   0x3   :  { %v16_v2 = vsub.f32 %v15_v1, %v14_v0 }
   0x4   :  { %19 = vst [vmem:[%s78_s3] sm:$0xff] %v34_v3 }
   0x5   :  { %17 = vst [vmem:[%s77_s2] sm:$0xff] %v16_v2 }
   0x6   :  { %21 = vst [vmem:[%s79_s4] sm:$0xff] %v20_v4 }

</bundles_post_ra>
